<compile_context>
chip_gen: v7x
topology: tpu7x:2x2x1
jax: 0.10.0
libtpu: 0.0.40
codegen_flags: <defaults>
</compile_context>

<pallas_src>
import math

import jax
import jax.numpy as jnp
from jax.experimental import pallas as pl
from jax.experimental.pallas import tpu as pltpu


def _packed_mlp_kernel(x_ref, w1_ref, w2_ref, b1_ref, b2_ref, o_ref):
    """Fused two-layer MLP with ReLU on the lane-packed layout.

    x_ref  : (TB, P*D_in)     packed activations (P samples per row)
    w1_ref : (P*D_in, P*H)    block-diagonal layer-1 weight
    w2_ref : (P*H, P*D_out)   block-diagonal layer-2 weight
    b1_ref : (1, P*H)         tiled layer-1 bias
    b2_ref : (1, P*D_out)     tiled layer-2 bias
    o_ref  : (TB, P*D_out)
    """
    x = x_ref[...]
    # Layer 1: MXU matmul with f32 accumulation, bias + ReLU on the VPU (f32).
    h = jnp.dot(x, w1_ref[...], preferred_element_type=jnp.float32)
    h = jnp.maximum(h + b1_ref[...], 0.0)
    # Layer 2.
    y = jnp.dot(h, w2_ref[...], preferred_element_type=jnp.float32)
    y = jnp.maximum(y + b2_ref[...], 0.0)
    o_ref[...] = y.astype(o_ref.dtype)


def _round_up(n, m):
    return pl.cdiv(n, m) * m


def _default_pack_factor():
    """P=16 on v6e/v7x (256-wide MXU), P=8 otherwise (v5e-safe default)."""
    try:
        kind = jax.devices()[0].device_kind.lower()
    except Exception:  # pragma: no cover - backend not initialized
        return 8
    if "v6" in kind or "v7" in kind:
        return 16
    return 8


def scalar_feature_extractor(x, w1, b1, w2, b2, *, block_b=1024, pack=None):
    """x (B, D_in) -> (B, D_out).  Lane-packed, batch-tiled fused MLP."""
    B, d_in = x.shape
    d_h = w1.shape[1]
    d_out = w2.shape[1]
    assert w1.shape == (d_in, d_h)
    assert b1.shape == (1, d_h)
    assert w2.shape == (d_h, d_out)
    assert b2.shape == (1, d_out)

    p = int(pack) if pack is not None else _default_pack_factor()
    assert p >= 1

    # ---- pack P samples into the lane dimension (free row-major reshapes) ---
    b_pad = _round_up(B, p)
    if b_pad != B:
        # <= p-1 pad rows; negligible traffic (unlike padding to a tile multiple).
        x = jnp.pad(x, ((0, b_pad - B), (0, 0)))
    rows = b_pad // p
    x_packed = x.reshape(rows, p * d_in)

    # Block-diagonal weights + tiled biases, built once outside the kernel.
    w1_bd = jnp.kron(jnp.eye(p, dtype=w1.dtype), w1)      # (p*d_in, p*d_h)
    w2_bd = jnp.kron(jnp.eye(p, dtype=w2.dtype), w2)      # (p*d_h, p*d_out)
    b1_t = jnp.tile(b1, (1, p))                           # (1, p*d_h)
    b2_t = jnp.tile(b2, (1, p))                           # (1, p*d_out)

    # Row tile: multiple of 8 sublanes, capped at block_b, and capped near
    # rows/2 so the parallel grid axis has >= 2 steps (v7x megacore) whenever
    # there is enough work.  Partial last block is handled by Pallas masking.
    tb = max(8, min(block_b, _round_up(pl.cdiv(rows, 2), 8)))
    grid = (pl.cdiv(rows, tb),)

    out_packed = pl.pallas_call(
        _packed_mlp_kernel,
        out_shape=jax.ShapeDtypeStruct((rows, p * d_out), x.dtype),
        grid=grid,
        in_specs=[
            pl.BlockSpec((tb, p * d_in), lambda i: (i, 0)),        # x: tiled over rows
            pl.BlockSpec((p * d_in, p * d_h), lambda i: (0, 0)),   # w1_bd: resident
            pl.BlockSpec((p * d_h, p * d_out), lambda i: (0, 0)),  # w2_bd: resident
            pl.BlockSpec((1, p * d_h), lambda i: (0, 0)),          # b1: resident
            pl.BlockSpec((1, p * d_out), lambda i: (0, 0)),        # b2: resident
        ],
        out_specs=pl.BlockSpec((tb, p * d_out), lambda i: (i, 0)),
        compiler_params=pltpu.CompilerParams(
            dimension_semantics=("parallel",),                     # no cross-step carry
        ),
    )(x_packed, w1_bd, w2_bd, b1_t, b2_t)

    out = out_packed.reshape(b_pad, d_out)                         # free reshape
    return out[:B] if b_pad != B else out


def _xavier_uniform(key, fan_in, fan_out, dtype=jnp.float32):
    # Matches nn.init.xavier_uniform_ (gain=1): U(-a, a), a = sqrt(6/(fan_in+fan_out)).
    a = math.sqrt(6.0 / (fan_in + fan_out))
    return jax.random.uniform(key, (fan_in, fan_out), dtype, minval=-a, maxval=a)


def _reference(x, w1, b1, w2, b2):
    hp = jax.lax.Precision.HIGHEST
    h = jnp.maximum(jnp.dot(x, w1, precision=hp) + b1, 0.0)
    return jnp.maximum(jnp.dot(h, w2, precision=hp) + b2, 0.0)


if __name__ == "__main__":
    input_dim = 16
    hidden = 64
    output_dim = 64

    key = jax.random.PRNGKey(0)
    kx, kx2, k1, k2 = jax.random.split(key, 4)

    # Deterministic parameter init (Xavier-uniform weights, zero biases),
    # stored as (in, out) so the kernel does x @ W (== PyTorch x @ W.T).
    w1 = _xavier_uniform(k1, input_dim, hidden)
    b1 = jnp.zeros((1, hidden), jnp.float32)
    w2 = _xavier_uniform(k2, hidden, output_dim)
    b2 = jnp.zeros((1, output_dim), jnp.float32)

    # Small spec-consistent case (batch=2): single grid step, pack padding path.
    x_small = jax.random.normal(kx, (2, input_dim), jnp.float32)
    out_small = jax.block_until_ready(scalar_feature_extractor(x_small, w1, b1, w2, b2))
    ref_small = _reference(x_small, w1, b1, w2, b2)
    assert out_small.shape == (2, output_dim)
    assert jnp.allclose(out_small, ref_small, atol=1e-4, rtol=1e-4)

    # Ragged moderate batch: exercises >= 2 grid steps and the masked tail block.
    x_big = jax.random.normal(kx2, (300, input_dim), jnp.float32)
    out_big = jax.block_until_ready(scalar_feature_extractor(x_big, w1, b1, w2, b2))
    ref_big = _reference(x_big, w1, b1, w2, b2)
    assert out_big.shape == (300, output_dim)
    assert jnp.allclose(out_big, ref_big, atol=1e-4, rtol=1e-4)

    print("KERNEL_OK")
</pallas_src>

<mosaic_0001>
module attributes {stable_mosaic.version = 11 : i64} {
  func.func @_packed_mlp_kernel(%arg0: i32, %arg1: memref<8x128xf32, #tpu.memory_space<vmem>>, %arg2: memref<128x512xf32, #tpu.memory_space<vmem>>, %arg3: memref<512x512xf32, #tpu.memory_space<vmem>>, %arg4: memref<1x512xf32, #tpu.memory_space<vmem>>, %arg5: memref<1x512xf32, #tpu.memory_space<vmem>>, %arg6: memref<8x512xf32, #tpu.memory_space<vmem>>) attributes {dimension_semantics = [#tpu.dimension_semantics<parallel>], iteration_bounds = array<i64: 1>, scalar_prefetch = 0 : i64, scratch_operands = 0 : i64, tpu.core_type = #tpu.core_type<tc>, window_params = [{transform_indices = @transform_0, window_bounds = array<i64: 8, 128>}, {pipeline_mode = #tpu.pipeline_mode<synchronous>, transform_indices = @transform_1, window_bounds = array<i64: 128, 512>}, {pipeline_mode = #tpu.pipeline_mode<synchronous>, transform_indices = @transform_2, window_bounds = array<i64: 512, 512>}, {pipeline_mode = #tpu.pipeline_mode<synchronous>, transform_indices = @transform_3, window_bounds = array<i64: 1, 512>}, {pipeline_mode = #tpu.pipeline_mode<synchronous>, transform_indices = @transform_4, window_bounds = array<i64: 1, 512>}, {transform_indices = @transform_5, window_bounds = array<i64: 8, 512>}]} {
    %c0 = arith.constant 0 : index
    %c0_0 = arith.constant 0 : index
    %0 = vector.load %arg1[%c0, %c0_0] : memref<8x128xf32, #tpu.memory_space<vmem>>, vector<8x128xf32>
    %c0_1 = arith.constant 0 : index
    %c0_2 = arith.constant 0 : index
    %1 = vector.load %arg2[%c0_1, %c0_2] : memref<128x512xf32, #tpu.memory_space<vmem>>, vector<128x512xf32>
    %cst = arith.constant dense<0.000000e+00> : vector<8x512xf32>
    %2 = tpu.matmul %0, %1, %cst {dimension_numbers = #tpu.dot_dimension_numbers<[1], [0], [0], [1], [0, 0, 1, 1], [], []>} : vector<8x128xf32>, vector<128x512xf32>, vector<8x512xf32> -> vector<8x512xf32>
    %c0_3 = arith.constant 0 : index
    %c0_4 = arith.constant 0 : index
    %3 = vector.load %arg4[%c0_3, %c0_4] : memref<1x512xf32, #tpu.memory_space<vmem>>, vector<1x512xf32>
    %4 = vector.broadcast %3 : vector<1x512xf32> to vector<8x512xf32>
    %5 = arith.addf %2, %4 : vector<8x512xf32>
    %cst_5 = arith.constant 0.000000e+00 : f32
    %6 = vector.broadcast %cst_5 : f32 to vector<8x512xf32>
    %7 = arith.maximumf %5, %6 : vector<8x512xf32>
    %c0_6 = arith.constant 0 : index
    %c0_7 = arith.constant 0 : index
    %8 = vector.load %arg3[%c0_6, %c0_7] : memref<512x512xf32, #tpu.memory_space<vmem>>, vector<512x512xf32>
    %cst_8 = arith.constant dense<0.000000e+00> : vector<8x512xf32>
    %9 = tpu.matmul %7, %8, %cst_8 {dimension_numbers = #tpu.dot_dimension_numbers<[1], [0], [0], [1], [0, 0, 1, 1], [], []>} : vector<8x512xf32>, vector<512x512xf32>, vector<8x512xf32> -> vector<8x512xf32>
    %c0_9 = arith.constant 0 : index
    %c0_10 = arith.constant 0 : index
    %10 = vector.load %arg5[%c0_9, %c0_10] : memref<1x512xf32, #tpu.memory_space<vmem>>, vector<1x512xf32>
    %11 = vector.broadcast %10 : vector<1x512xf32> to vector<8x512xf32>
    %12 = arith.addf %9, %11 : vector<8x512xf32>
    %cst_11 = arith.constant 0.000000e+00 : f32
    %13 = vector.broadcast %cst_11 : f32 to vector<8x512xf32>
    %14 = arith.maximumf %12, %13 : vector<8x512xf32>
    %c0_12 = arith.constant 0 : index
    %c0_13 = arith.constant 0 : index
    %15 = vector.load %arg6[%c0_12, %c0_13] : memref<8x512xf32, #tpu.memory_space<vmem>>, vector<8x512xf32>
    tpu.vector_store %arg6[%c0_12, %c0_13], %14 {strides = array<i32>} : memref<8x512xf32, #tpu.memory_space<vmem>>, vector<8x512xf32>,
    return
  }
  func.func @transform_0(%arg0: i32) -> (i32, i32) {
    %c0_i32 = arith.constant 0 : i32
    %c0_i32_0 = arith.constant 0 : i32
    return %arg0, %c0_i32 : i32, i32
  }
  func.func @transform_1(%arg0: i32) -> (i32, i32) {
    %c0_i32 = arith.constant 0 : i32
    %c0_i32_0 = arith.constant 0 : i32
    %c0_i32_1 = arith.constant 0 : i32
    return %c0_i32, %c0_i32_0 : i32, i32
  }
  func.func @transform_2(%arg0: i32) -> (i32, i32) {
    %c0_i32 = arith.constant 0 : i32
    %c0_i32_0 = arith.constant 0 : i32
    %c0_i32_1 = arith.constant 0 : i32
    return %c0_i32, %c0_i32_0 : i32, i32
  }
  func.func @transform_3(%arg0: i32) -> (i32, i32) {
    %c0_i32 = arith.constant 0 : i32
    %c0_i32_0 = arith.constant 0 : i32
    %c0_i32_1 = arith.constant 0 : i32
    return %c0_i32, %c0_i32_0 : i32, i32
  }
  func.func @transform_4(%arg0: i32) -> (i32, i32) {
    %c0_i32 = arith.constant 0 : i32
    %c0_i32_0 = arith.constant 0 : i32
    %c0_i32_1 = arith.constant 0 : i32
    return %c0_i32, %c0_i32_0 : i32, i32
  }
  func.func @transform_5(%arg0: i32) -> (i32, i32) {
    %c0_i32 = arith.constant 0 : i32
    %c0_i32_0 = arith.constant 0 : i32
    return %arg0, %c0_i32 : i32, i32
  }
}

</mosaic_0001>

<bundles_post_ra>
// kernel: tpu_custom_call.1
= control target key start
LH: loop header
LB: loop body
LE: loop exit
PB: predicated region body
PF: predicated region fallthrough
CT: control target
= control target key end

     0   :  { %10 = vsyncpa [#allocation3], 0  ;;  %s1561_s0 = inlined_call_operand.hbm [shape: f32[1,128], index: 0, kind: input, shape index: {}]   ;;  %s1562_s1 = inlined_call_operand.hbm [shape: f32[128,512], index: 1, kind: input, shape index: {}]   ;;  %s1563_s2 = inlined_call_operand.hbm [shape: f32[512,512], index: 2, kind: input, shape index: {}]   ;;  %s1564_s3 = inlined_call_operand.vmem [shape: f32[1,512], index: 3, kind: input, shape index: {}]   ;;  %s1565_s4 = inlined_call_operand.vmem [shape: f32[1,512], index: 4, kind: input, shape index: {}]   ;;  %s1566_s5 = inlined_call_operand.hbm [shape: f32[1,512], index: 5, kind: output, shape index: {}]  }
   0x1   :  { %11 = vsyncpa [#allocation6], 0 }
   0x2   :  { %12 = vsyncpa [#allocation4], 0 }
   0x3   :  { %17 = vsyncadd [#allocation3], 112  ;;  %s1405_s18 = smov [#allocation5]   ;;  %s1311_s22 = scalar_lea.hbm %s1562_s1, 8192 }
   0x4   :  { %s30_s19 = sshll.u32 %s1405_s18, 4  ;;  %p1312_p0 = scmp.ne.s32.totalorder %s1562_s1, %s1311_s22  ;;  %s31_s19 = int_to_ptr.vmem [resolvable:$true] %s30_s19 }
   0x5   :  { %p1315_p1 = scmp.lt.u32.totalorder %s1311_s22, %s1562_s1 }
   0x7   :  { %p1317_p2 = pnand %p1315_p1, %p1312_p0 }
   0x9   :  { %1320 = shalt.err (!%p1317_p2)
}
   0xa   :  { %s1321_s27 = scalar_lea.vmem %s31_s19, 8192  ;;  %p1326_p4 = scmp.lt.s32.totalorder %s31_s19, %s31_s19 }
   0xb   :  { %p1322_p3 = scmp.ne.s32.totalorder %s31_s19, %s1321_s27  ;;  %p1327_p5 = scmp.lt.s32.totalorder %s1321_s27, %s1321_s27 }
   0xd   :  { %p1328_p6 = por %p1327_p5, %p1326_p4 }
   0xf   :  { %p1329_p7 = pnand %p1328_p6, %p1322_p3 }
  0x11   :  { %1332 = shalt.err (!%p1329_p7)
}
  0x12   :  { %s1406_s28 = smov 512   ;;  %s1407_s29 = smov 32  }
  0x13   :  { %36 = dma.hbm_to_vmem [thread:$0]  %s1562_s1, 8192, %s31_s19, [#allocation6], %s1406_s28, %s1406_s28, %s1407_s29  }
  0x14   :  { %s1408_s7 = smov [#allocation2]   ;;  %s1333_s11 = scalar_lea.hbm %s1561_s0, 16 }
  0x15   :  { %s18_s8 = sshll.u32 %s1408_s7, 4  ;;  %p1334_p8 = scmp.ne.s32.totalorder %s1561_s0, %s1333_s11  ;;  %s19_s8 = int_to_ptr.vmem [resolvable:$true] %s18_s8 }
  0x16   :  { %p1337_p9 = scmp.lt.u32.totalorder %s1333_s11, %s1561_s0 }
  0x18   :  { %p1339_p10 = pnand %p1337_p9, %p1334_p8 }
  0x1a   :  { %1342 = shalt.err (!%p1339_p10)
}
  0x1b   :  { %s1343_s16 = scalar_lea.vmem %s19_s8, 16  ;;  %s1347_s1 = scalar_lea.vmem %s19_s8, 128 }
  0x1c   :  { %p1344_p11 = scmp.ne.s32.totalorder %s19_s8, %s1343_s16  ;;  %p1348_p12 = scmp.lt.s32.totalorder %s19_s8, %s19_s8 }
  0x1d   :  { %p1349_p13 = scmp.lt.s32.totalorder %s1347_s1, %s1343_s16 }
  0x1f   :  { %p1350_p0 = por %p1349_p13, %p1348_p12 }
  0x21   :  { %p1351_p1 = pnand %p1350_p0, %p1344_p11 }
  0x23   :  { %1354 = shalt.err (!%p1351_p1)
}
  0x24   :  { %s1409_s17 = smov 16   ;;  %s1410_s18 = smov 1  }
  0x25   :  { %24 = dma.hbm_to_vmem [thread:$0]  %s1561_s0, 16, %s19_s8, [#allocation3], %s1409_s17, %s1409_s17, %s1410_s18  }
  0x26   :  { %s1411_s21 = smov [#allocation7]   ;;  %s1355_s25 = scalar_lea.hbm %s1563_s2, 32768 }
  0x27   :  { %s42_s22 = sshll.u32 %s1411_s21, 4  ;;  %p1356_p2 = scmp.ne.s32.totalorder %s1563_s2, %s1355_s25  ;;  %s43_s22 = int_to_ptr.vmem [resolvable:$true] %s42_s22 }
  0x28   :  { %p1359_p3 = scmp.lt.u32.totalorder %s1355_s25, %s1563_s2 }
  0x2a   :  { %p1361_p4 = pnand %p1359_p3, %p1356_p2 }
  0x2c   :  { %1364 = shalt.err (!%p1361_p4)
}
  0x2d   :  { %s1365_s7 = scalar_lea.vmem %s43_s22, 32768  ;;  %p1370_p6 = scmp.lt.s32.totalorder %s43_s22, %s43_s22 }
  0x2e   :  { %p1366_p5 = scmp.ne.s32.totalorder %s43_s22, %s1365_s7  ;;  %p1371_p7 = scmp.lt.s32.totalorder %s1365_s7, %s1365_s7 }
  0x30   :  { %p1372_p8 = por %p1371_p7, %p1370_p6 }
  0x32   :  { %p1373_p9 = pnand %p1372_p8, %p1366_p5 }
  0x34   :  { %1376 = shalt.err (!%p1373_p9)
}
  0x35   :  { %48 = dma.hbm_to_vmem [thread:$0]  %s1563_s2, 32768, %s43_s22, [#allocation6], %s1406_s28, %s1406_s28, %s1407_s29  }
  0x36   :  { %1399 = dma.done.wait [#allocation3], 128  }
  0x37   :  { %1400 = vsyncadd [#allocation3], 4294967168 }
  0x38   :  { %1401 = dma.done.wait [#allocation6], 40960  }
  0x39   :  { %1402 = vsyncadd [#allocation6], 4294926336  ;;  %v1412_v0 = vmov 0.0   ;;  %v64_v1 = vld [vmem:[#allocation5 + $0x8] sm:$0xff]  ;;  %v63_v3 = vld [vmem:[#allocation5] sm:$0xff] }
  0x3a   :  { %213 = vmatprep.mubr.f32.mxu0 %v1412_v0  ;;  %284 = vmatprep.mubr.f32.mxu1 %v1412_v0  ;;  %v68_v2 = vld [vmem:[#allocation5 + $0x28] sm:$0xff]  ;;  %v67_v5 = vld [vmem:[#allocation5 + $0x20] sm:$0xff]  ;;  %v66_v28 = vld [vmem:[#allocation5 + $0x18] sm:$0xff] }
  0x3b   :  { %v971_v4 = vpack.c.bf16 %v68_v2, %v64_v1  ;;  %v72_v6 = vld [vmem:[#allocation5 + $0x48] sm:$0xff]  ;;  %v973_v8 = vpack.c.bf16 %v67_v5, %v63_v3  ;;  %v71_v10 = vld [vmem:[#allocation5 + $0x40] sm:$0xff]  ;;  %v70_v29 = vld [vmem:[#allocation5 + $0x38] sm:$0xff] }
  0x3c   :  { %v76_v7 = vld [vmem:[#allocation5 + $0x68] sm:$0xff]  ;;  %v75_v11 = vld [vmem:[#allocation5 + $0x60] sm:$0xff]  ;;  %v65_v30 = vld [vmem:[#allocation5 + $0x10] sm:$0xff]  ;;  %v1003_v32 = vpack.c.bf16 %v70_v29, %v66_v28 }
  0x3d   :  { %v975_v9 = vpack.c.bf16 %v76_v7, %v72_v6  ;;  %v80_v12 = vld [vmem:[#allocation5 + $0x88] sm:$0xff]  ;;  %972 = vmatprep.subr.bf16.mxu0 %v971_v4  ;;  %v977_v14 = vpack.c.bf16 %v75_v11, %v71_v10  ;;  %v79_v16 = vld [vmem:[#allocation5 + $0x80] sm:$0xff]  ;;  %v69_v33 = vld [vmem:[#allocation5 + $0x30] sm:$0xff] }
  0x3e   :  { %v84_v13 = vld [vmem:[#allocation5 + $0xa8] sm:$0xff]  ;;  %974 = vmatpush1.bf16.msra.mxu0 %v973_v8  ;;  %v83_v17 = vld [vmem:[#allocation5 + $0xa0] sm:$0xff]  ;;  %v74_v34 = vld [vmem:[#allocation5 + $0x58] sm:$0xff]  ;;  %v1005_v37 = vpack.c.bf16 %v69_v33, %v65_v30  ;;  %1004 = vmatprep.subr.bf16.mxu1 %v1003_v32 }
  0x3f   :  { %976 = vmatprep.subr.bf16.mxu0 %v975_v9  ;;  %v979_v15 = vpack.c.bf16 %v84_v13, %v80_v12  ;;  %v88_v18 = vld [vmem:[#allocation5 + $0xc8] sm:$0xff]  ;;  %v981_v20 = vpack.c.bf16 %v83_v17, %v79_v16  ;;  %v87_v22 = vld [vmem:[#allocation5 + $0xc0] sm:$0xff]  ;;  %v78_v35 = vld [vmem:[#allocation5 + $0x78] sm:$0xff] }
  0x40   :  { %v92_v19 = vld [vmem:[#allocation5 + $0xe8] sm:$0xff]  ;;  %v91_v23 = vld [vmem:[#allocation5 + $0xe0] sm:$0xff]  ;;  %v1007_v38 = vpack.c.bf16 %v78_v35, %v74_v34  ;;  %v73_v39 = vld [vmem:[#allocation5 + $0x50] sm:$0xff]  ;;  %1006 = vmatpush1.bf16.msra.mxu1 %v1005_v37 }
  0x41   :  { %v983_v21 = vpack.c.bf16 %v92_v19, %v88_v18  ;;  %v96_v24 = vld [vmem:[#allocation5 + $0x108] sm:$0xff]  ;;  %v95_v26 = vld [vmem:[#allocation5 + $0x100] sm:$0xff]  ;;  %v985_v31 = vpack.c.bf16 %v91_v23, %v87_v22  ;;  %v77_v40 = vld [vmem:[#allocation5 + $0x70] sm:$0xff] }
  0x42   :  { %978 = vmatpush1.bf16.msra.mxu0 %v977_v14  ;;  %v100_v25 = vld [vmem:[#allocation5 + $0x128] sm:$0xff]  ;;  %v99_v27 = vld [vmem:[#allocation5 + $0x120] sm:$0xff]  ;;  %v82_v41 = vld [vmem:[#allocation5 + $0x98] sm:$0xff]  ;;  %v1009_v45 = vpack.c.bf16 %v77_v40, %v73_v39  ;;  %1008 = vmatprep.subr.bf16.mxu1 %v1007_v38 }
  0x43   :  { %980 = vmatprep.subr.bf16.mxu0 %v979_v15  ;;  %v987_v36 = vpack.c.bf16 %v100_v25, %v96_v24  ;;  %v104_v42 = vld [vmem:[#allocation5 + $0x148] sm:$0xff]  ;;  %v86_v44 = vld [vmem:[#allocation5 + $0xb8] sm:$0xff]  ;;  %v989_v46 = vpack.c.bf16 %v99_v27, %v95_v26  ;;  %v103_v47 = vld [vmem:[#allocation5 + $0x140] sm:$0xff] }
  0x44   :  { %v108_v43 = vld [vmem:[#allocation5 + $0x168] sm:$0xff]  ;;  %v1011_v48 = vpack.c.bf16 %v86_v44, %v82_v41  ;;  %v81_v49 = vld [vmem:[#allocation5 + $0x90] sm:$0xff]  ;;  %v107_v52 = vld [vmem:[#allocation5 + $0x160] sm:$0xff]  ;;  %1010 = vmatpush1.bf16.msra.mxu1 %v1009_v45 }
  0x45   :  { %v85_v50 = vld [vmem:[#allocation5 + $0xb0] sm:$0xff]  ;;  %v991_v51 = vpack.c.bf16 %v108_v43, %v104_v42  ;;  %v90_v53 = vld [vmem:[#allocation5 + $0xd8] sm:$0xff]  ;;  %v112_v55 = vld [vmem:[#allocation5 + $0x188] sm:$0xff]  ;;  %v993_v58 = vpack.c.bf16 %v107_v52, %v103_v47 }
  0x46   :  { %982 = vmatpush1.bf16.msra.mxu0 %v981_v20  ;;  %v94_v54 = vld [vmem:[#allocation5 + $0xf8] sm:$0xff]  ;;  %v116_v56 = vld [vmem:[#allocation5 + $0x1a8] sm:$0xff]  ;;  %v1013_v57 = vpack.c.bf16 %v85_v50, %v81_v49  ;;  %v111_v59 = vld [vmem:[#allocation5 + $0x180] sm:$0xff]  ;;  %1012 = vmatprep.subr.bf16.mxu1 %v1011_v48 }
  0x47   :  { %984 = vmatprep.subr.bf16.mxu0 %v983_v21  ;;  %v1015_v60 = vpack.c.bf16 %v94_v54, %v90_v53  ;;  %v89_v61 = vld [vmem:[#allocation5 + $0xd0] sm:$0xff]  ;;  %v995_v63 = vpack.c.bf16 %v116_v56, %v112_v55  ;;  %v115_v0 = vld [vmem:[#allocation5 + $0x1a0] sm:$0xff]  ;;  %v98_v1 = vld [vmem:[#allocation5 + $0x118] sm:$0xff] }
  0x48   :  { %v93_v62 = vld [vmem:[#allocation5 + $0xf0] sm:$0xff]  ;;  %v102_v2 = vld [vmem:[#allocation5 + $0x138] sm:$0xff]  ;;  %v120_v3 = vld [vmem:[#allocation5 + $0x1c8] sm:$0xff]  ;;  %1014 = vmatpush1.bf16.msra.mxu1 %v1013_v57  ;;  %v997_v6 = vpack.c.bf16 %v115_v0, %v111_v59 }
  0x49   :  { %v124_v4 = vld [vmem:[#allocation5 + $0x1e8] sm:$0xff]  ;;  %v1017_v5 = vpack.c.bf16 %v93_v62, %v89_v61  ;;  %v119_v7 = vld [vmem:[#allocation5 + $0x1c0] sm:$0xff]  ;;  %1016 = vmatprep.subr.bf16.mxu1 %v1015_v60  ;;  %v1019_v8 = vpack.c.bf16 %v102_v2, %v98_v1  ;;  %v97_v9 = vld [vmem:[#allocation5 + $0x110] sm:$0xff] }
  0x4a   :  { %986 = vmatpush1.bf16.msra.mxu0 %v985_v31  ;;  %v101_v10 = vld [vmem:[#allocation5 + $0x130] sm:$0xff]  ;;  %v999_v11 = vpack.c.bf16 %v124_v4, %v120_v3  ;;  %v123_v12 = vld [vmem:[#allocation5 + $0x1e0] sm:$0xff]  ;;  %v106_v13 = vld [vmem:[#allocation5 + $0x158] sm:$0xff] }
  0x4b   :  { %988 = vmatprep.subr.bf16.mxu0 %v987_v36  ;;  %v110_v14 = vld [vmem:[#allocation5 + $0x178] sm:$0xff]  ;;  %v296_v15 = vld [vmem:[#allocation7 + $0x8] sm:$0xff]  ;;  %v1021_v17 = vpack.c.bf16 %v101_v10, %v97_v9  ;;  %v1001_v18 = vpack.c.bf16 %v123_v12, %v119_v7  ;;  %v105_v20 = vld [vmem:[#allocation5 + $0x150] sm:$0xff] }
  0x4c   :  { %v300_v16 = vld [vmem:[#allocation7 + $0x28] sm:$0xff]  ;;  %1018 = vmatpush1.bf16.msra.mxu1 %v1017_v5  ;;  %v1023_v19 = vpack.c.bf16 %v110_v14, %v106_v13  ;;  %v109_v21 = vld [vmem:[#allocation5 + $0x170] sm:$0xff]  ;;  %v114_v22 = vld [vmem:[#allocation5 + $0x198] sm:$0xff] }
  0x4d   :  { %1020 = vmatprep.subr.bf16.mxu1 %v1019_v8  ;;  %v118_v23 = vld [vmem:[#allocation5 + $0x1b8] sm:$0xff]  ;;  %v1035_v24 = vpack.c.bf16 %v300_v16, %v296_v15  ;;  %v295_v25 = vld [vmem:[#allocation7] sm:$0xff]  ;;  %v304_v27 = vld [vmem:[#allocation7 + $0x48] sm:$0xff]  ;;  %v1025_v30 = vpack.c.bf16 %v109_v21, %v105_v20 }
  0x4e   :  { %990 = vmatpush1.bf16.msra.mxu0 %v989_v46  ;;  %v299_v26 = vld [vmem:[#allocation7 + $0x20] sm:$0xff]  ;;  %v308_v28 = vld [vmem:[#allocation7 + $0x68] sm:$0xff]  ;;  %v1489_v29 = vld [vmem:[#allocation2] sm:$0xff]  ;;  %v1027_v31 = vpack.c.bf16 %v118_v23, %v114_v22 }
  0x4f   :  { %992 = vmatprep.subr.bf16.mxu0 %v991_v51  ;;  %v113_v32 = vld [vmem:[#allocation5 + $0x190] sm:$0xff]  ;;  %v122_v34 = vld [vmem:[#allocation5 + $0x1d8] sm:$0xff]  ;;  %v1037_v35 = vpack.c.bf16 %v299_v26, %v295_v25  ;;  %v1039_v37 = vpack.c.bf16 %v308_v28, %v304_v27  ;;  %v303_v38 = vld [vmem:[#allocation7 + $0x40] sm:$0xff] }
  0x50   :  { %1022 = vmatpush1.bf16.msra.mxu1 %v1021_v17  ;;  %v117_v33 = vld [vmem:[#allocation5 + $0x1b0] sm:$0xff]  ;;  %v126_v36 = vld [vmem:[#allocation5 + $0x1f8] sm:$0xff]  ;;  %v307_v39 = vld [vmem:[#allocation7 + $0x60] sm:$0xff] }
  0x51   :  { %1024 = vmatprep.subr.bf16.mxu1 %v1023_v19  ;;  %v312_v40 = vld [vmem:[#allocation7 + $0x88] sm:$0xff]  ;;  %v1029_v42 = vpack.c.bf16 %v117_v33, %v113_v32  ;;  %v1031_v43 = vpack.c.bf16 %v126_v36, %v122_v34  ;;  %v121_v44 = vld [vmem:[#allocation5 + $0x1d0] sm:$0xff]  ;;  %v298_v46 = vld [vmem:[#allocation7 + $0x18] sm:$0xff]  ;;  %v1041_v47 = vpack.c.bf16 %v307_v39, %v303_v38 }
  0x52   :  { %994 = vmatpush1.bf16.msra.mxu0 %v993_v58  ;;  %v316_v41 = vld [vmem:[#allocation7 + $0xa8] sm:$0xff]  ;;  %v125_v45 = vld [vmem:[#allocation5 + $0x1f0] sm:$0xff]  ;;  %v302_v48 = vld [vmem:[#allocation7 + $0x38] sm:$0xff] }
  0x53   :  { %996 = vmatprep.subr.bf16.mxu0 %v995_v63  ;;  %v1043_v49 = vpack.c.bf16 %v316_v41, %v312_v40  ;;  %v311_v50 = vld [vmem:[#allocation7 + $0x80] sm:$0xff]  ;;  %v320_v52 = vld [vmem:[#allocation7 + $0xc8] sm:$0xff]  ;;  %v1033_v54 = vpack.c.bf16 %v125_v45, %v121_v44  ;;  %v1163_v55 = vpack.c.bf16 %v302_v48, %v298_v46  ;;  %v297_v56 = vld [vmem:[#allocation7 + $0x10] sm:$0xff] }
  0x54   :  { %1026 = vmatpush1.bf16.msra.mxu1 %v1025_v30  ;;  %v315_v51 = vld [vmem:[#allocation7 + $0xa0] sm:$0xff]  ;;  %v324_v53 = vld [vmem:[#allocation7 + $0xe8] sm:$0xff]  ;;  %v301_v57 = vld [vmem:[#allocation7 + $0x30] sm:$0xff] }
  0x55   :  { %1028 = vmatprep.subr.bf16.mxu1 %v1027_v31  ;;  %v306_v58 = vld [vmem:[#allocation7 + $0x58] sm:$0xff]  ;;  %v1045_v59 = vpack.c.bf16 %v315_v51, %v311_v50  ;;  %v1047_v61 = vpack.c.bf16 %v324_v53, %v320_v52  ;;  %v319_v62 = vld [vmem:[#allocation7 + $0xc0] sm:$0xff]  ;;  %v328_v0 = vld [vmem:[#allocation7 + $0x108] sm:$0xff]  ;;  %v1165_v2 = vpack.c.bf16 %v301_v57, %v297_v56 }
  0x56   :  { %998 = vmatpush1.bf16.msra.mxu0 %v997_v6  ;;  %v310_v60 = vld [vmem:[#allocation7 + $0x78] sm:$0xff]  ;;  %v323_v63 = vld [vmem:[#allocation7 + $0xe0] sm:$0xff]  ;;  %v332_v1 = vld [vmem:[#allocation7 + $0x128] sm:$0xff] }
  0x57   :  { %1000 = vmatprep.subr.bf16.mxu0 %v999_v11  ;;  %v1167_v3 = vpack.c.bf16 %v310_v60, %v306_v58  ;;  %v305_v4 = vld [vmem:[#allocation7 + $0x50] sm:$0xff]  ;;  %v314_v6 = vld [vmem:[#allocation7 + $0x98] sm:$0xff]  ;;  %v1049_v7 = vpack.c.bf16 %v323_v63, %v319_v62  ;;  %v1051_v9 = vpack.c.bf16 %v332_v1, %v328_v0  ;;  %v327_v10 = vld [vmem:[#allocation7 + $0x100] sm:$0xff] }
  0x58   :  { %1030 = vmatpush1.bf16.msra.mxu1 %v1029_v42  ;;  %v309_v5 = vld [vmem:[#allocation7 + $0x70] sm:$0xff]  ;;  %v318_v8 = vld [vmem:[#allocation7 + $0xb8] sm:$0xff]  ;;  %v331_v11 = vld [vmem:[#allocation7 + $0x120] sm:$0xff] }
  0x59   :  { %1032 = vmatprep.subr.bf16.mxu1 %v1031_v43  ;;  %v336_v12 = vld [vmem:[#allocation7 + $0x148] sm:$0xff]  ;;  %v1169_v14 = vpack.c.bf16 %v309_v5, %v305_v4  ;;  %v1171_v15 = vpack.c.bf16 %v318_v8, %v314_v6  ;;  %v313_v16 = vld [vmem:[#allocation7 + $0x90] sm:$0xff]  ;;  %v1053_v19 = vpack.c.bf16 %v331_v11, %v327_v10  ;;  %v326_v20 = vld [vmem:[#allocation7 + $0xf8] sm:$0xff] }
  0x5a   :  { %1002 = vmatpush1.bf16.msra.mxu0 %v1001_v18  ;;  %v340_v13 = vld [vmem:[#allocation7 + $0x168] sm:$0xff]  ;;  %v317_v17 = vld [vmem:[#allocation7 + $0xb0] sm:$0xff]  ;;  %v322_v18 = vld [vmem:[#allocation7 + $0xd8] sm:$0xff] }
  0x5b   :  { %1036 = vmatprep.subr.bf16.mxu0 %v1035_v24  ;;  %v1055_v21 = vpack.c.bf16 %v340_v13, %v336_v12  ;;  %v335_v22 = vld [vmem:[#allocation7 + $0x140] sm:$0xff]  ;;  %v344_v24 = vld [vmem:[#allocation7 + $0x188] sm:$0xff]  ;;  %v1173_v26 = vpack.c.bf16 %v317_v17, %v313_v16  ;;  %v1175_v27 = vpack.c.bf16 %v326_v20, %v322_v18  ;;  %v321_v28 = vld [vmem:[#allocation7 + $0xd0] sm:$0xff] }
  0x5c   :  { %1034 = vmatpush1.bf16.msra.mxu1 %v1033_v54  ;;  %v339_v23 = vld [vmem:[#allocation7 + $0x160] sm:$0xff]  ;;  %v348_v25 = vld [vmem:[#allocation7 + $0x1a8] sm:$0xff]  ;;  %v330_v30 = vld [vmem:[#allocation7 + $0x118] sm:$0xff] }
  0x5d   :  { %214 = vmatmul.mubr.f32.vlgmr.msra.gmra.mrb[0].mxu0 %v1489_v29  ;;  %1164 = vmatprep.subr.bf16.mxu1 %v1163_v55  ;;  %v1057_v31 = vpack.c.bf16 %v339_v23, %v335_v22  ;;  %v334_v32 = vld [vmem:[#allocation7 + $0x138] sm:$0xff]  ;;  %v1059_v33 = vpack.c.bf16 %v348_v25, %v344_v24  ;;  %v343_v34 = vld [vmem:[#allocation7 + $0x180] sm:$0xff]  ;;  %v352_v36 = vld [vmem:[#allocation7 + $0x1c8] sm:$0xff] }
  0x5e   :  { %1038 = vmatpush1.bf16.msra.mxu0 %v1037_v35  ;;  %v347_v35 = vld [vmem:[#allocation7 + $0x1a0] sm:$0xff]  ;;  %v1179_v39 = vpack.c.bf16 %v334_v32, %v330_v30  ;;  %v329_v40 = vld [vmem:[#allocation7 + $0x110] sm:$0xff]  ;;  %v338_v42 = vld [vmem:[#allocation7 + $0x158] sm:$0xff] }
  0x5f   :  { %1040 = vmatprep.subr.bf16.mxu0 %v1039_v37  ;;  %285 = vmatmul.mubr.f32.vlgmr.msra.gmra.mrb[0].mxu1 %v1489_v29  ;;  %v325_v29 = vld [vmem:[#allocation7 + $0xf0] sm:$0xff]  ;;  %v356_v37 = vld [vmem:[#allocation7 + $0x1e8] sm:$0xff]  ;;  %v1061_v43 = vpack.c.bf16 %v347_v35, %v343_v34  ;;  %v342_v44 = vld [vmem:[#allocation7 + $0x178] sm:$0xff] }
  0x60   :  { %1166 = vmatpush1.bf16.msra.mxu1 %v1165_v2  ;;  %v1177_v38 = vpack.c.bf16 %v325_v29, %v321_v28  ;;  %v333_v41 = vld [vmem:[#allocation7 + $0x130] sm:$0xff]  ;;  %v1063_v45 = vpack.c.bf16 %v356_v37, %v352_v36  ;;  %v351_v46 = vld [vmem:[#allocation7 + $0x1c0] sm:$0xff]  ;;  %v360_v48 = vld [vmem:[#allocation7 + $0x208] sm:$0xff]  ;;  %v1183_v51 = vpack.c.bf16 %v342_v44, %v338_v42 }
  0x61   :  { %1168 = vmatprep.subr.bf16.mxu1 %v1167_v3  ;;  %v1181_v50 = vpack.c.bf16 %v333_v41, %v329_v40  ;;  %v337_v52 = vld [vmem:[#allocation7 + $0x150] sm:$0xff]  ;;  %v346_v54 = vld [vmem:[#allocation7 + $0x198] sm:$0xff]  ;;  %v359_v58 = vld [vmem:[#allocation7 + $0x200] sm:$0xff] }
  0x62   :  { %1042 = vmatpush1.bf16.msra.mxu0 %v1041_v47  ;;  %v355_v47 = vld [vmem:[#allocation7 + $0x1e0] sm:$0xff]  ;;  %v341_v53 = vld [vmem:[#allocation7 + $0x170] sm:$0xff]  ;;  %v350_v56 = vld [vmem:[#allocation7 + $0x1b8] sm:$0xff] }
  0x63   :  { %1044 = vmatprep.subr.bf16.mxu0 %v1043_v49  ;;  %v364_v49 = vld [vmem:[#allocation7 + $0x228] sm:$0xff]  ;;  %v1065_v55 = vpack.c.bf16 %v355_v47, %v351_v46  ;;  %v1185_v62 = vpack.c.bf16 %v341_v53, %v337_v52  ;;  %v1187_v63 = vpack.c.bf16 %v350_v56, %v346_v54  ;;  %v345_v0 = vld [vmem:[#allocation7 + $0x190] sm:$0xff]  ;;  %v354_v2 = vld [vmem:[#allocation7 + $0x1d8] sm:$0xff] }
  0x64   :  { %1170 = vmatpush1.bf16.msra.mxu1 %v1169_v14  ;;  %v1067_v57 = vpack.c.bf16 %v364_v49, %v360_v48  ;;  %v368_v60 = vld [vmem:[#allocation7 + $0x248] sm:$0xff]  ;;  %v349_v1 = vld [vmem:[#allocation7 + $0x1b0] sm:$0xff]  ;;  %v358_v4 = vld [vmem:[#allocation7 + $0x1f8] sm:$0xff] }
  0x65   :  { %1172 = vmatprep.subr.bf16.mxu1 %v1171_v15  ;;  %v367_v6 = vld [vmem:[#allocation7 + $0x240] sm:$0xff]  ;;  %v376_v8 = vld [vmem:[#allocation7 + $0x288] sm:$0xff]  ;;  %v1189_v10 = vpack.c.bf16 %v349_v1, %v345_v0  ;;  %v1191_v11 = vpack.c.bf16 %v358_v4, %v354_v2  ;;  %v353_v12 = vld [vmem:[#allocation7 + $0x1d0] sm:$0xff] }
  0x66   :  { %1046 = vmatpush1.bf16.msra.mxu0 %v1045_v59  ;;  %v363_v59 = vld [vmem:[#allocation7 + $0x220] sm:$0xff]  ;;  %v357_v13 = vld [vmem:[#allocation7 + $0x1f0] sm:$0xff]  ;;  %v362_v14 = vld [vmem:[#allocation7 + $0x218] sm:$0xff] }
  0x67   :  { %1048 = vmatprep.subr.bf16.mxu0 %v1047_v61  ;;  %v372_v61 = vld [vmem:[#allocation7 + $0x268] sm:$0xff]  ;;  %v1069_v3 = vpack.c.bf16 %v363_v59, %v359_v58  ;;  %v366_v16 = vld [vmem:[#allocation7 + $0x238] sm:$0xff]  ;;  %v375_v18 = vld [vmem:[#allocation7 + $0x280] sm:$0xff]  ;;  %v1193_v22 = vpack.c.bf16 %v357_v13, %v353_v12 }
  0x68   :  { %1174 = vmatpush1.bf16.msra.mxu1 %v1173_v26  ;;  %v1071_v5 = vpack.c.bf16 %v372_v61, %v368_v60  ;;  %v384_v20 = vld [vmem:[#allocation7 + $0x2c8] sm:$0xff]  ;;  %v1195_v23 = vpack.c.bf16 %v366_v16, %v362_v14  ;;  %v361_v24 = vld [vmem:[#allocation7 + $0x210] sm:$0xff]  ;;  %v370_v26 = vld [vmem:[#allocation7 + $0x258] sm:$0xff] }
  0x69   :  { %1176 = vmatprep.subr.bf16.mxu1 %v1175_v27  ;;  %v365_v25 = vld [vmem:[#allocation7 + $0x230] sm:$0xff]  ;;  %v374_v28 = vld [vmem:[#allocation7 + $0x278] sm:$0xff]  ;;  %v383_v30 = vld [vmem:[#allocation7 + $0x2c0] sm:$0xff] }
  0x6a   :  { %1050 = vmatpush1.bf16.msra.mxu0 %v1049_v7  ;;  %v371_v7 = vld [vmem:[#allocation7 + $0x260] sm:$0xff]  ;;  %v392_v32 = vld [vmem:[#allocation7 + $0x308] sm:$0xff]  ;;  %v1197_v34 = vpack.c.bf16 %v365_v25, %v361_v24  ;;  %v1199_v35 = vpack.c.bf16 %v374_v28, %v370_v26  ;;  %v369_v36 = vld [vmem:[#allocation7 + $0x250] sm:$0xff] }
  0x6b   :  { %1052 = vmatprep.subr.bf16.mxu0 %v1051_v9  ;;  %v380_v9 = vld [vmem:[#allocation7 + $0x2a8] sm:$0xff]  ;;  %v1073_v15 = vpack.c.bf16 %v371_v7, %v367_v6  ;;  %v373_v37 = vld [vmem:[#allocation7 + $0x270] sm:$0xff]  ;;  %v382_v40 = vld [vmem:[#allocation7 + $0x2b8] sm:$0xff] }
  0x6c   :  { %1178 = vmatpush1.bf16.msra.mxu1 %v1177_v38  ;;  %v1075_v17 = vpack.c.bf16 %v380_v9, %v376_v8  ;;  %v378_v38 = vld [vmem:[#allocation7 + $0x298] sm:$0xff]  ;;  %v391_v42 = vld [vmem:[#allocation7 + $0x300] sm:$0xff]  ;;  %v400_v44 = vld [vmem:[#allocation7 + $0x348] sm:$0xff]  ;;  %v1201_v46 = vpack.c.bf16 %v373_v37, %v369_v36 }
  0x6d   :  { %1180 = vmatprep.subr.bf16.mxu1 %v1179_v39  ;;  %v1203_v47 = vpack.c.bf16 %v382_v40, %v378_v38  ;;  %v377_v48 = vld [vmem:[#allocation7 + $0x290] sm:$0xff]  ;;  %v390_v52 = vld [vmem:[#allocation7 + $0x2f8] sm:$0xff]  ;;  %v399_v54 = vld [vmem:[#allocation7 + $0x340] sm:$0xff]  ;;  %v129_v40 = vlaneseq }
  0x6e   :  { %1054 = vmatpush1.bf16.msra.mxu0 %v1053_v19  ;;  %v379_v19 = vld [vmem:[#allocation7 + $0x2a0] sm:$0xff]  ;;  %v381_v49 = vld [vmem:[#allocation7 + $0x2b0] sm:$0xff]  ;;  %v408_v56 = vld [vmem:[#allocation7 + $0x388] sm:$0xff] }
  0x6f   :  { %1056 = vmatprep.subr.bf16.mxu0 %v1055_v21  ;;  %v388_v21 = vld [vmem:[#allocation7 + $0x2e8] sm:$0xff]  ;;  %v1077_v27 = vpack.c.bf16 %v379_v19, %v375_v18  ;;  %v1205_v58 = vpack.c.bf16 %v381_v49, %v377_v48  ;;  %v385_v60 = vld [vmem:[#allocation7 + $0x2d0] sm:$0xff]  ;;  %v398_v0 = vld [vmem:[#allocation7 + $0x338] sm:$0xff]  ;;  %vm1529_vm0 = vcmp.lt.s32.totalorder %v129_v40, 512 }
  0x70   :  { %1182 = vmatpush1.bf16.msra.mxu1 %v1181_v50  ;;  %v1079_v29 = vpack.c.bf16 %v388_v21, %v384_v20  ;;  %v386_v50 = vld [vmem:[#allocation7 + $0x2d8] sm:$0xff]  ;;  %v389_v61 = vld [vmem:[#allocation7 + $0x2f0] sm:$0xff]  ;;  %v407_v2 = vld [vmem:[#allocation7 + $0x380] sm:$0xff] }
  0x71   :  { %1184 = vmatprep.subr.bf16.mxu1 %v1183_v51  ;;  %v1207_v59 = vpack.c.bf16 %v390_v52, %v386_v50  ;;  %v1209_v4 = vpack.c.bf16 %v389_v61, %v385_v60  ;;  %v393_v6 = vld [vmem:[#allocation7 + $0x310] sm:$0xff]  ;;  %v402_v9 = vld [vmem:[#allocation7 + $0x358] sm:$0xff]  ;;  %v419_v28 = vld [vmem:[#allocation7 + $0x3e0] sm:$0xff] }
  0x72   :  { %1058 = vmatpush1.bf16.msra.mxu0 %v1057_v31  ;;  %v387_v31 = vld [vmem:[#allocation7 + $0x2e0] sm:$0xff]  ;;  %v397_v7 = vld [vmem:[#allocation7 + $0x330] sm:$0xff]  ;;  %v414_v16 = vld [vmem:[#allocation7 + $0x3b8] sm:$0xff] }
  0x73   :  { %1060 = vmatprep.subr.bf16.mxu0 %v1059_v33  ;;  %v396_v33 = vld [vmem:[#allocation7 + $0x328] sm:$0xff]  ;;  %v1081_v39 = vpack.c.bf16 %v387_v31, %v383_v30  ;;  %v401_v13 = vld [vmem:[#allocation7 + $0x350] sm:$0xff]  ;;  %v418_v24 = vld [vmem:[#allocation7 + $0x3d8] sm:$0xff] }
  0x74   :  { %1186 = vmatpush1.bf16.msra.mxu1 %v1185_v62  ;;  %v1083_v41 = vpack.c.bf16 %v396_v33, %v392_v32  ;;  %v394_v62 = vld [vmem:[#allocation7 + $0x318] sm:$0xff]  ;;  %v405_v14 = vld [vmem:[#allocation7 + $0x370] sm:$0xff]  ;;  %v423_v48 = vld [vmem:[#allocation7 + $0x400] sm:$0xff] }
  0x75   :  { %1188 = vmatprep.subr.bf16.mxu1 %v1187_v63  ;;  %v409_v19 = vld [vmem:[#allocation7 + $0x390] sm:$0xff]  ;;  %v422_v26 = vld [vmem:[#allocation7 + $0x3f8] sm:$0xff]  ;;  %v427_v49 = vld [vmem:[#allocation7 + $0x420] sm:$0xff] }
  0x76   :  { %1062 = vmatpush1.bf16.msra.mxu0 %v1061_v43  ;;  %v395_v43 = vld [vmem:[#allocation7 + $0x320] sm:$0xff]  ;;  %v413_v20 = vld [vmem:[#allocation7 + $0x3b0] sm:$0xff]  ;;  %v426_v36 = vld [vmem:[#allocation7 + $0x418] sm:$0xff]  ;;  %v1101_v60 = vpack.c.bf16 %v427_v49, %v423_v48 }
  0x77   :  { %1064 = vmatprep.subr.bf16.mxu0 %v1063_v45  ;;  %v404_v45 = vld [vmem:[#allocation7 + $0x368] sm:$0xff]  ;;  %v1085_v51 = vpack.c.bf16 %v395_v43, %v391_v42  ;;  %v1221_v21 = vpack.c.bf16 %v413_v20, %v409_v19  ;;  %v417_v31 = vld [vmem:[#allocation7 + $0x3d0] sm:$0xff]  ;;  %v430_v38 = vld [vmem:[#allocation7 + $0x438] sm:$0xff] }
  0x78   :  { %1190 = vmatpush1.bf16.msra.mxu1 %v1189_v10  ;;  %v1087_v53 = vpack.c.bf16 %v404_v45, %v400_v44  ;;  %v406_v10 = vld [vmem:[#allocation7 + $0x378] sm:$0xff]  ;;  %v421_v32 = vld [vmem:[#allocation7 + $0x3f0] sm:$0xff]  ;;  %v1500_v43 = vld [vmem:[%s1564_s3] sm:$0xf] }
  0x79   :  { %1192 = vmatprep.subr.bf16.mxu1 %v1191_v11  ;;  %v1213_v11 = vpack.c.bf16 %v397_v7, %v393_v6  ;;  %v1215_v12 = vpack.c.bf16 %v406_v10, %v402_v9  ;;  %v1225_v33 = vpack.c.bf16 %v421_v32, %v417_v31  ;;  %v425_v52 = vld [vmem:[#allocation7 + $0x410] sm:$0xff]  ;;  %v444_v7 = vld [vmem:[#allocation7 + $0x4a8] sm:$0xff]  ;;  %v446_v9 = vld [vmem:[#allocation7 + $0x4b8] sm:$0xff] }
  0x7a   :  { %1066 = vmatpush1.bf16.msra.mxu0 %v1065_v55  ;;  %v403_v55 = vld [vmem:[#allocation7 + $0x360] sm:$0xff]  ;;  %v452_v20 = vld [vmem:[#allocation7 + $0x4e8] sm:$0xff]  ;;  %v449_v31 = vld [vmem:[#allocation7 + $0x4d0] sm:$0xff] }
  0x7b   :  { %1068 = vmatprep.subr.bf16.mxu0 %v1067_v57  ;;  %v412_v57 = vld [vmem:[#allocation7 + $0x3a8] sm:$0xff]  ;;  %v1089_v63 = vpack.c.bf16 %v403_v55, %v399_v54  ;;  %v453_v32 = vld [vmem:[#allocation7 + $0x4f0] sm:$0xff] }
  0x7c   :  { %1194 = vmatpush1.bf16.msra.mxu1 %v1193_v22  ;;  %v1091_v1 = vpack.c.bf16 %v412_v57, %v408_v56  ;;  %v416_v22 = vld [vmem:[#allocation7 + $0x3c8] sm:$0xff]  ;;  %v434_v57 = vld [vmem:[#allocation7 + $0x458] sm:$0xff] }
  0x7d   :  { %1196 = vmatprep.subr.bf16.mxu1 %v1195_v23  ;;  %v420_v23 = vld [vmem:[#allocation7 + $0x3e8] sm:$0xff] }
  0x7e   :  { %1070 = vmatpush1.bf16.msra.mxu0 %v1069_v3  ;;  %v411_v3 = vld [vmem:[#allocation7 + $0x3a0] sm:$0xff]  ;;  %v1095_v25 = vpack.c.bf16 %v420_v23, %v416_v22  ;;  %v432_v54 = vld [vmem:[#allocation7 + $0x448] sm:$0xff]  ;;  %v454_v22 = vld [vmem:[#allocation7 + $0x4f8] sm:$0xff] }
  0x7f   :  { %1072 = vmatprep.subr.bf16.mxu0 %v1071_v5  ;;  %v1211_v5 = vpack.c.bf16 %v398_v0, %v394_v62  ;;  %v1093_v8 = vpack.c.bf16 %v411_v3, %v407_v2  ;;  %v436_v56 = vld [vmem:[#allocation7 + $0x468] sm:$0xff]  ;;  %v431_v62 = vld [vmem:[#allocation7 + $0x440] sm:$0xff]  ;;  %v433_v3 = vld [vmem:[#allocation7 + $0x450] sm:$0xff] }
  0x80   :  { %1198 = vmatpush1.bf16.msra.mxu1 %v1197_v34  ;;  %v424_v34 = vld [vmem:[#allocation7 + $0x408] sm:$0xff] }
  0x81   :  { %1200 = vmatprep.subr.bf16.mxu1 %v1199_v35  ;;  %v428_v35 = vld [vmem:[#allocation7 + $0x428] sm:$0xff] }
  0x82   :  { %1074 = vmatpush1.bf16.msra.mxu0 %v1073_v15  ;;  %v410_v15 = vld [vmem:[#allocation7 + $0x398] sm:$0xff]  ;;  %v1099_v37 = vpack.c.bf16 %v428_v35, %v424_v34  ;;  %v460_v35 = vld [vmem:[#allocation7 + $0x528] sm:$0xff] }
  0x83   :  { %1076 = vmatprep.subr.bf16.mxu0 %v1075_v17  ;;  %v1217_v17 = vpack.c.bf16 %v405_v14, %v401_v13  ;;  %v1219_v18 = vpack.c.bf16 %v414_v16, %v410_v15  ;;  %v443_v13 = vld [vmem:[#allocation7 + $0x4a0] sm:$0xff]  ;;  %v441_v16 = vld [vmem:[#allocation7 + $0x490] sm:$0xff] }
  0x84   :  { %1202 = vmatpush1.bf16.msra.mxu1 %v1201_v46 }
  0x85   :  { %1204 = vmatprep.subr.bf16.mxu1 %v1203_v47 }
  0x86   :  { %1078 = vmatpush1.bf16.msra.mxu0 %v1077_v27  ;;  %v415_v27 = vld [vmem:[#allocation7 + $0x3c0] sm:$0xff] }
  0x87   :  { %1080 = vmatprep.subr.bf16.mxu0 %v1079_v29  ;;  %v1223_v29 = vpack.c.bf16 %v422_v26, %v418_v24  ;;  %v1097_v30 = vpack.c.bf16 %v419_v28, %v415_v27  ;;  %v447_v26 = vld [vmem:[#allocation7 + $0x4c0] sm:$0xff] }
  0x88   :  { %1206 = vmatpush1.bf16.msra.mxu1 %v1205_v58  ;;  %v438_v58 = vld [vmem:[#allocation7 + $0x478] sm:$0xff]  ;;  %v451_v27 = vld [vmem:[#allocation7 + $0x4e0] sm:$0xff] }
  0x89   :  { %1208 = vmatprep.subr.bf16.mxu1 %v1207_v59  ;;  %v1231_v2 = vpack.c.bf16 %v438_v58, %v434_v57  ;;  %v463_v58 = vld [vmem:[#allocation7 + $0x540] sm:$0xff] }
  0x8a   :  { %1082 = vmatpush1.bf16.msra.mxu0 %v1081_v39  ;;  %v1227_v39 = vpack.c.bf16 %v430_v38, %v426_v36  ;;  %v458_v36 = vld [vmem:[#allocation7 + $0x518] sm:$0xff] }
  0x8b   :  { %1084 = vmatprep.subr.bf16.mxu0 %v1083_v41  ;;  %v1494_v41 = vshrl.u32 %v129_v40, 7 }
  0x8c   :  { %1210 = vmatpush1.bf16.msra.mxu1 %v1209_v4  ;;  %v437_v4 = vld [vmem:[#allocation7 + $0x470] sm:$0xff] }
  0x8d   :  { %1212 = vmatprep.subr.bf16.mxu1 %v1211_v5  ;;  %v131_v42 = vsub.s32 0, %v1494_v41  ;;  %v135_v44 = vsub.s32 1, %v1494_v41  ;;  %v440_v5 = vld [vmem:[#allocation7 + $0x488] sm:$0xff]  ;;  %v143_v6 = vsub.s32 3, %v1494_v41 }
  0x8e   :  { %1086 = vmatpush1.bf16.msra.mxu0 %v1085_v51  ;;  %v1107_v14 = vpack.c.bf16 %v444_v7, %v440_v5  ;;  %v471_v7 = vld [vmem:[#allocation7 + $0x580] sm:$0xff] }
  0x8f   :  { %1088 = vmatprep.subr.bf16.mxu0 %v1087_v53  ;;  %v132_v45 = vrot.slane %v1500_v43, %v131_v42  ;;  %v136_v46 = vrot.slane %v1500_v43, %v135_v44  ;;  %v429_v53 = vld [vmem:[#allocation7 + $0x430] sm:$0xff]  ;;  %v144_v19 = vrot.slane %v1500_v43, %v143_v6 }
  0x90   :  { %1214 = vmatpush1.bf16.msra.mxu1 %v1213_v11  ;;  %v1229_v61 = vpack.c.bf16 %v429_v53, %v425_v52  ;;  %v1233_v11 = vpack.c.bf16 %v437_v4, %v433_v3  ;;  %v464_v52 = vld [vmem:[#allocation7 + $0x548] sm:$0xff]  ;;  %v478_v3 = vld [vmem:[#allocation7 + $0x5b8] sm:$0xff] }
  0x91   :  { %1216 = vmatprep.subr.bf16.mxu1 %v1215_v12  ;;  %v439_v12 = vld [vmem:[#allocation7 + $0x480] sm:$0xff]  ;;  %v468_v53 = vld [vmem:[#allocation7 + $0x568] sm:$0xff] }
  0x92   :  { %1090 = vmatpush1.bf16.msra.mxu0 %v1089_v63  ;;  %v435_v63 = vld [vmem:[#allocation7 + $0x460] sm:$0xff]  ;;  %v1109_v24 = vpack.c.bf16 %v443_v13, %v439_v12  ;;  %v477_v12 = vld [vmem:[#allocation7 + $0x5b0] sm:$0xff]  ;;  %v480_v13 = vld [vmem:[#allocation7 + $0x5c8] sm:$0xff] }
  0x93   :  { %1092 = vmatprep.subr.bf16.mxu0 %v1091_v1  ;;  %v1103_v1 = vpack.c.bf16 %v436_v56, %v432_v54  ;;  %v1105_v10 = vpack.c.bf16 %v435_v63, %v431_v62  ;;  %v466_v54 = vld [vmem:[#allocation7 + $0x558] sm:$0xff]  ;;  %v465_v62 = vld [vmem:[#allocation7 + $0x550] sm:$0xff] }
  0x94   :  { %1218 = vmatpush1.bf16.msra.mxu1 %v1217_v17  ;;  %v445_v17 = vld [vmem:[#allocation7 + $0x4b0] sm:$0xff] }
  0x95   :  { %1220 = vmatprep.subr.bf16.mxu1 %v1219_v18  ;;  %v448_v18 = vld [vmem:[#allocation7 + $0x4c8] sm:$0xff]  ;;  %v469_v63 = vld [vmem:[#allocation7 + $0x570] sm:$0xff] }
  0x96   :  { %1094 = vmatpush1.bf16.msra.mxu0 %v1093_v8  ;;  %v442_v8 = vld [vmem:[#allocation7 + $0x498] sm:$0xff]  ;;  %v1249_v5 = vpack.c.bf16 %v469_v63, %v465_v62  ;;  %v507_v62 = vld [vmem:[#allocation7 + $0x6a0] sm:$0xff] }
  0x97   :  { %1096 = vmatprep.subr.bf16.mxu0 %v1095_v25  ;;  %v1235_v15 = vpack.c.bf16 %v446_v9, %v442_v8  ;;  %v1237_v25 = vpack.c.bf16 %v445_v17, %v441_v16  ;;  %v475_v8 = vld [vmem:[#allocation7 + $0x5a0] sm:$0xff]  ;;  %v486_v16 = vld [vmem:[#allocation7 + $0x5f8] sm:$0xff] }
  0x98   :  { %1222 = vmatpush1.bf16.msra.mxu1 %v1221_v21  ;;  %v450_v21 = vld [vmem:[#allocation7 + $0x4d8] sm:$0xff]  ;;  %v1125_v17 = vpack.c.bf16 %v475_v8, %v471_v7 }
  0x99   :  { %1224 = vmatprep.subr.bf16.mxu1 %v1223_v29  ;;  %v1111_v29 = vpack.c.bf16 %v452_v20, %v448_v18  ;;  %v483_v20 = vld [vmem:[#allocation7 + $0x5e0] sm:$0xff]  ;;  %v518_v7 = vld [vmem:[#allocation7 + $0x6f8] sm:$0xff] }
  0x9a   :  { %1098 = vmatpush1.bf16.msra.mxu0 %v1097_v30  ;;  %v1239_v30 = vpack.c.bf16 %v454_v22, %v450_v21 }
  0x9b   :  { %1100 = vmatprep.subr.bf16.mxu0 %v1099_v37  ;;  %v462_v37 = vld [vmem:[#allocation7 + $0x538] sm:$0xff] }
  0x9c   :  { %1226 = vmatpush1.bf16.msra.mxu1 %v1225_v33  ;;  %v456_v33 = vld [vmem:[#allocation7 + $0x508] sm:$0xff]  ;;  %v1243_v49 = vpack.c.bf16 %v462_v37, %v458_v36  ;;  %v489_v36 = vld [vmem:[#allocation7 + $0x610] sm:$0xff] }
  0x9d   :  { %1228 = vmatprep.subr.bf16.mxu1 %v1227_v39  ;;  %v1113_v39 = vpack.c.bf16 %v451_v27, %v447_v26  ;;  %v1115_v48 = vpack.c.bf16 %v460_v35, %v456_v33  ;;  %v488_v26 = vld [vmem:[#allocation7 + $0x608] sm:$0xff]  ;;  %v491_v33 = vld [vmem:[#allocation7 + $0x620] sm:$0xff]  ;;  %v493_v37 = vld [vmem:[#allocation7 + $0x630] sm:$0xff] }
  0x9e   :  { %v492_v27 = vld [vmem:[#allocation7 + $0x628] sm:$0xff] }
 0x130   :  { %v215_v47 = vpop.f32.mrb[0].mxu0 }
 0x131   :  { %v216_v50 = vadd.f32 %v215_v47, %v132_v45  ;;  %v217_v51 = vpop.f32.mrb[1].mxu0  ;;  %v1241_v45 = vpack.c.bf16 %v453_v32, %v449_v31  ;;  %v459_v47 = vld [vmem:[#allocation7 + $0x520] sm:$0xff] }
 0x132   :  { %v218_v55 = vadd.f32 %v217_v51, %v136_v46  ;;  %v1513_v23 = vpop.f32.mrb[0].mxu1  ;;  %v455_v46 = vld [vmem:[#allocation7 + $0x500] sm:$0xff]  ;;  %v461_v51 = vld [vmem:[#allocation7 + $0x530] sm:$0xff] }
 0x133   :  { %v291_v0 = vmax.f32 %v216_v50, 0.0  ;;  %v288_v28 = vpop.f32.mrb[1].mxu1  ;;  %v457_v50 = vld [vmem:[#allocation7 + $0x510] sm:$0xff]  ;;  %v1117_v56 = vpack.c.bf16 %v459_v47, %v455_v46  ;;  %v487_v32 = vld [vmem:[#allocation7 + $0x600] sm:$0xff]  ;;  %v502_v46 = vld [vmem:[#allocation7 + $0x678] sm:$0xff] }
 0x134   :  { %v292_v59 = vmax.f32 %v218_v55, 0.0  ;;  %v289_v34 = vadd.f32 %v288_v28, %v144_v19  ;;  %v470_v55 = vld [vmem:[#allocation7 + $0x578] sm:$0xff]  ;;  %v1245_v57 = vpack.c.bf16 %v461_v51, %v457_v50  ;;  %v479_v19 = vld [vmem:[#allocation7 + $0x5c0] sm:$0xff]  ;;  %v1133_v47 = vpack.c.bf16 %v491_v33, %v487_v32 }
 0x135   :  { %v490_v28 = vld [vmem:[#allocation7 + $0x618] sm:$0xff]  ;;  %v499_v50 = vld [vmem:[#allocation7 + $0x660] sm:$0xff] }
 0x136   :  { %637 = vmatprep.mubr.f32.mxu0 %v292_v59  ;;  %779 = vmatprep.mubr.f32.mxu1 %v292_v59  ;;  %v294_v38 = vmax.f32 %v289_v34, 0.0  ;;  %v467_v59 = vld [vmem:[#allocation7 + $0x560] sm:$0xff]  ;;  %v1131_v34 = vpack.c.bf16 %v492_v27, %v488_v26  ;;  %v521_v27 = vld [vmem:[#allocation7 + $0x710] sm:$0xff]  ;;  %v534_v32 = vld [vmem:[#allocation7 + $0x778] sm:$0xff] }
 0x137   :  { %638 = vmatmul.mubr.f32.vlgmr.msra.gmra.mrb[2].mxu0 %v291_v0  ;;  %780 = vmatmul.mubr.f32.vlgmr.msra.gmra.mrb[2].mxu1 %v291_v0  ;;  %v472_v0 = vld [vmem:[#allocation7 + $0x588] sm:$0xff]  ;;  %v1121_v4 = vpack.c.bf16 %v467_v59, %v463_v58  ;;  %v510_v58 = vld [vmem:[#allocation7 + $0x6b8] sm:$0xff] }
 0x138   :  { %1102 = vmatpush1.bf16.msra.mxu0 %v1101_v60  ;;  %1230 = vmatpush1.bf16.msra.mxu1 %v1229_v61  ;;  %v1119_v60 = vpack.c.bf16 %v468_v53, %v464_v52  ;;  %v1247_v61 = vpack.c.bf16 %v470_v55, %v466_v54  ;;  %v497_v53 = vld [vmem:[#allocation7 + $0x650] sm:$0xff]  ;;  %v504_v55 = vld [vmem:[#allocation7 + $0x688] sm:$0xff] }
 0x139   :  { %1104 = vmatprep.subr.bf16.mxu0 %v1103_v1  ;;  %1232 = vmatprep.subr.bf16.mxu1 %v1231_v2  ;;  %v476_v1 = vld [vmem:[#allocation7 + $0x5a8] sm:$0xff]  ;;  %v474_v2 = vld [vmem:[#allocation7 + $0x598] sm:$0xff]  ;;  %v501_v54 = vld [vmem:[#allocation7 + $0x670] sm:$0xff] }
 0x13a   :  { %708 = vmatprep.mubr.f32.mxu0 %v294_v38  ;;  %850 = vmatprep.mubr.f32.mxu1 %v294_v38  ;;  %v1123_v9 = vpack.c.bf16 %v476_v1, %v472_v0  ;;  %v496_v38 = vld [vmem:[#allocation7 + $0x648] sm:$0xff]  ;;  %v505_v1 = vld [vmem:[#allocation7 + $0x690] sm:$0xff] }
 0x13c   :  { %1106 = vmatpush1.bf16.msra.mxu0 %v1105_v10  ;;  %1234 = vmatpush1.bf16.msra.mxu1 %v1233_v11  ;;  %v1251_v10 = vpack.c.bf16 %v478_v3, %v474_v2  ;;  %v473_v11 = vld [vmem:[#allocation7 + $0x590] sm:$0xff]  ;;  %v512_v3 = vld [vmem:[#allocation7 + $0x6c8] sm:$0xff] }
 0x13d   :  { %1108 = vmatprep.subr.bf16.mxu0 %v1107_v14  ;;  %1236 = vmatprep.subr.bf16.mxu1 %v1235_v15  ;;  %v484_v14 = vld [vmem:[#allocation7 + $0x5e8] sm:$0xff]  ;;  %v482_v15 = vld [vmem:[#allocation7 + $0x5d8] sm:$0xff]  ;;  %v1253_v18 = vpack.c.bf16 %v477_v12, %v473_v11  ;;  %v509_v2 = vld [vmem:[#allocation7 + $0x6b0] sm:$0xff] }
 0x13e   :  { %v1127_v21 = vpack.c.bf16 %v484_v14, %v480_v13  ;;  %v1255_v22 = vpack.c.bf16 %v486_v16, %v482_v15  ;;  %v515_v11 = vld [vmem:[#allocation7 + $0x6e0] sm:$0xff]  ;;  %v513_v14 = vld [vmem:[#allocation7 + $0x6d0] sm:$0xff]  ;;  %v520_v16 = vld [vmem:[#allocation7 + $0x708] sm:$0xff] }
 0x13f   :  { %v517_v15 = vld [vmem:[#allocation7 + $0x6f0] sm:$0xff] }
 0x140   :  { %1110 = vmatpush1.bf16.msra.mxu0 %v1109_v24  ;;  %1238 = vmatpush1.bf16.msra.mxu1 %v1237_v25  ;;  %v481_v24 = vld [vmem:[#allocation7 + $0x5d0] sm:$0xff] }
 0x141   :  { %1112 = vmatprep.subr.bf16.mxu0 %v1111_v29  ;;  %1240 = vmatprep.subr.bf16.mxu1 %v1239_v30  ;;  %v485_v25 = vld [vmem:[#allocation7 + $0x5f0] sm:$0xff]  ;;  %v494_v29 = vld [vmem:[#allocation7 + $0x638] sm:$0xff]  ;;  %v1129_v30 = vpack.c.bf16 %v483_v20, %v479_v19 }
 0x142   :  { %v1257_v31 = vpack.c.bf16 %v485_v25, %v481_v24  ;;  %v1259_v35 = vpack.c.bf16 %v494_v29, %v490_v28  ;;  %v526_v19 = vld [vmem:[#allocation7 + $0x738] sm:$0xff]  ;;  %v523_v24 = vld [vmem:[#allocation7 + $0x720] sm:$0xff]  ;;  %v525_v28 = vld [vmem:[#allocation7 + $0x730] sm:$0xff] }
 0x143   :  { %v528_v29 = vld [vmem:[#allocation7 + $0x748] sm:$0xff] }
 0x144   :  { %1114 = vmatpush1.bf16.msra.mxu0 %v1113_v39  ;;  %1242 = vmatpush1.bf16.msra.mxu1 %v1241_v45  ;;  %v500_v39 = vld [vmem:[#allocation7 + $0x668] sm:$0xff]  ;;  %v498_v45 = vld [vmem:[#allocation7 + $0x658] sm:$0xff] }
 0x145   :  { %1116 = vmatprep.subr.bf16.mxu0 %v1115_v48  ;;  %1244 = vmatprep.subr.bf16.mxu1 %v1243_v49  ;;  %v1261_v48 = vpack.c.bf16 %v493_v37, %v489_v36  ;;  %v495_v49 = vld [vmem:[#allocation7 + $0x640] sm:$0xff]  ;;  %v1135_v51 = vpack.c.bf16 %v500_v39, %v496_v38  ;;  %v1263_v52 = vpack.c.bf16 %v502_v46, %v498_v45  ;;  %v529_v39 = vld [vmem:[#allocation7 + $0x750] sm:$0xff]  ;;  %v536_v46 = vld [vmem:[#allocation7 + $0x788] sm:$0xff] }
 0x146   :  { %v1137_v59 = vpack.c.bf16 %v499_v50, %v495_v49  ;;  %v531_v36 = vld [vmem:[#allocation7 + $0x760] sm:$0xff]  ;;  %v533_v45 = vld [vmem:[#allocation7 + $0x770] sm:$0xff]  ;;  %v542_v49 = vld [vmem:[#allocation7 + $0x7b8] sm:$0xff] }
 0x148   :  { %1118 = vmatpush1.bf16.msra.mxu0 %v1117_v56  ;;  %1246 = vmatpush1.bf16.msra.mxu1 %v1245_v57  ;;  %v508_v56 = vld [vmem:[#allocation7 + $0x6a8] sm:$0xff]  ;;  %v506_v57 = vld [vmem:[#allocation7 + $0x698] sm:$0xff] }
 0x149   :  { %1120 = vmatprep.subr.bf16.mxu0 %v1119_v60  ;;  %1248 = vmatprep.subr.bf16.mxu1 %v1247_v61  ;;  %v1265_v60 = vpack.c.bf16 %v501_v54, %v497_v53  ;;  %v503_v61 = vld [vmem:[#allocation7 + $0x680] sm:$0xff]  ;;  %v1139_v63 = vpack.c.bf16 %v508_v56, %v504_v55  ;;  %v1267_v0 = vpack.c.bf16 %v510_v58, %v506_v57  ;;  %v139_v54 = vsub.s32 2, %v1494_v41  ;;  %v537_v57 = vld [vmem:[#allocation7 + $0x790] sm:$0xff] }
 0x14a   :  { %v1141_v8 = vpack.c.bf16 %v507_v62, %v503_v61  ;;  %v539_v53 = vld [vmem:[#allocation7 + $0x7a0] sm:$0xff]  ;;  %v541_v58 = vld [vmem:[#allocation7 + $0x7b0] sm:$0xff]  ;;  %v546_v61 = vld [vmem:[#allocation7 + $0x7d8] sm:$0xff] }
 0x14b   :  { %v550_v62 = vld [vmem:[#allocation7 + $0x7f8] sm:$0xff] }
 0x14c   :  { %1122 = vmatpush1.bf16.msra.mxu0 %v1121_v4  ;;  %1250 = vmatpush1.bf16.msra.mxu1 %v1249_v5  ;;  %v516_v4 = vld [vmem:[#allocation7 + $0x6e8] sm:$0xff]  ;;  %v514_v5 = vld [vmem:[#allocation7 + $0x6d8] sm:$0xff] }
 0x14d   :  { %1124 = vmatprep.subr.bf16.mxu0 %v1123_v9  ;;  %1252 = vmatprep.subr.bf16.mxu1 %v1251_v10  ;;  %v1269_v9 = vpack.c.bf16 %v509_v2, %v505_v1  ;;  %v511_v10 = vld [vmem:[#allocation7 + $0x6c0] sm:$0xff]  ;;  %v1143_v12 = vpack.c.bf16 %v516_v4, %v512_v3  ;;  %v1271_v13 = vpack.c.bf16 %v518_v7, %v514_v5  ;;  %v545_v7 = vld [vmem:[#allocation7 + $0x7d0] sm:$0xff] }
 0x14e   :  { %v1145_v20 = vpack.c.bf16 %v515_v11, %v511_v10  ;;  %v543_v1 = vld [vmem:[#allocation7 + $0x7c0] sm:$0xff]  ;;  %v140_v2 = vrot.slane %v1500_v43, %v139_v54  ;;  %v1287_v4 = vpack.c.bf16 %v550_v62, %v546_v61  ;;  %v551_v43 = vld [vmem:[%s1565_s4] sm:$0xf] }
 0x14f   :  { %v547_v5 = vld [vmem:[#allocation7 + $0x7e0] sm:$0xff] }
 0x150   :  { %1126 = vmatpush1.bf16.msra.mxu0 %v1125_v17  ;;  %1254 = vmatpush1.bf16.msra.mxu1 %v1253_v18  ;;  %v524_v17 = vld [vmem:[#allocation7 + $0x728] sm:$0xff]  ;;  %v522_v18 = vld [vmem:[#allocation7 + $0x718] sm:$0xff]  ;;  %v287_v11 = vadd.f32 %v1513_v23, %v140_v2  ;;  %v560_v23 = vrot.slane %v551_v43, %v135_v44 }
 0x151   :  { %1128 = vmatprep.subr.bf16.mxu0 %v1127_v21  ;;  %1256 = vmatprep.subr.bf16.mxu1 %v1255_v22  ;;  %v1273_v21 = vpack.c.bf16 %v517_v15, %v513_v14  ;;  %v519_v22 = vld [vmem:[#allocation7 + $0x700] sm:$0xff]  ;;  %v1147_v25 = vpack.c.bf16 %v524_v17, %v520_v16  ;;  %v1275_v26 = vpack.c.bf16 %v526_v19, %v522_v18 }
 0x152   :  { %v1149_v33 = vpack.c.bf16 %v523_v24, %v519_v22  ;;  %v556_v15 = vrot.slane %v551_v43, %v131_v42  ;;  %v564_v16 = vrot.slane %v551_v43, %v139_v54  ;;  %v568_v17 = vrot.slane %v551_v43, %v143_v6 }
 0x154   :  { %1130 = vmatpush1.bf16.msra.mxu0 %v1129_v30  ;;  %1258 = vmatpush1.bf16.msra.mxu1 %v1257_v31  ;;  %v532_v30 = vld [vmem:[#allocation7 + $0x768] sm:$0xff]  ;;  %v530_v31 = vld [vmem:[#allocation7 + $0x758] sm:$0xff] }
 0x155   :  { %1132 = vmatprep.subr.bf16.mxu0 %v1131_v34  ;;  %1260 = vmatprep.subr.bf16.mxu1 %v1259_v35  ;;  %v1277_v34 = vpack.c.bf16 %v525_v28, %v521_v27  ;;  %v527_v35 = vld [vmem:[#allocation7 + $0x740] sm:$0xff]  ;;  %v1151_v37 = vpack.c.bf16 %v532_v30, %v528_v29  ;;  %v1279_v38 = vpack.c.bf16 %v534_v32, %v530_v31 }
 0x156   :  { %v1153_v50 = vpack.c.bf16 %v531_v36, %v527_v35 }
 0x158   :  { %1134 = vmatpush1.bf16.msra.mxu0 %v1133_v47  ;;  %1262 = vmatpush1.bf16.msra.mxu1 %v1261_v48  ;;  %v540_v47 = vld [vmem:[#allocation7 + $0x7a8] sm:$0xff]  ;;  %v538_v48 = vld [vmem:[#allocation7 + $0x798] sm:$0xff] }
 0x159   :  { %1136 = vmatprep.subr.bf16.mxu0 %v1135_v51  ;;  %1264 = vmatprep.subr.bf16.mxu1 %v1263_v52  ;;  %v1281_v51 = vpack.c.bf16 %v533_v45, %v529_v39  ;;  %v535_v52 = vld [vmem:[#allocation7 + $0x780] sm:$0xff]  ;;  %v1155_v55 = vpack.c.bf16 %v540_v47, %v536_v46  ;;  %v1283_v56 = vpack.c.bf16 %v542_v49, %v538_v48 }
 0x15c   :  { %1138 = vmatpush1.bf16.msra.mxu0 %v1137_v59  ;;  %1266 = vmatpush1.bf16.msra.mxu1 %v1265_v60  ;;  %v544_v59 = vld [vmem:[#allocation7 + $0x7c8] sm:$0xff] }
 0x15d   :  { %1140 = vmatprep.subr.bf16.mxu0 %v1139_v63  ;;  %1268 = vmatprep.subr.bf16.mxu1 %v1267_v0  ;;  %v548_v60 = vld [vmem:[#allocation7 + $0x7e8] sm:$0xff]  ;;  %v1157_v63 = vpack.c.bf16 %v539_v53, %v535_v52  ;;  %v1285_v0 = vpack.c.bf16 %v541_v58, %v537_v57 }
 0x15e   :  { %v1159_v3 = vpack.c.bf16 %v548_v60, %v544_v59 }
 0x160   :  { %1142 = vmatpush1.bf16.msra.mxu0 %v1141_v8  ;;  %1270 = vmatpush1.bf16.msra.mxu1 %v1269_v9  ;;  %v549_v8 = vld [vmem:[#allocation7 + $0x7f0] sm:$0xff]  ;;  %v1161_v9 = vpack.c.bf16 %v547_v5, %v543_v1 }
 0x161   :  { %1144 = vmatprep.subr.bf16.mxu0 %v1143_v12  ;;  %1272 = vmatprep.subr.bf16.mxu1 %v1271_v13  ;;  %v1289_v10 = vpack.c.bf16 %v549_v8, %v545_v7  ;;  %v293_v12 = vmax.f32 %v287_v11, 0.0  ;;  %v1413_v13 = vmov 1966171168  }
 0x162   :  { %v870_v14 = vunpack.c.l.s4 %v1413_v13 }
 0x164   :  { %1146 = vmatpush1.bf16.msra.mxu0 %v1145_v20  ;;  %1274 = vmatpush1.bf16.msra.mxu1 %v1273_v21  ;;  %v871_v18 = vunpack.c.0.s8 %v870_v14 }
 0x165   :  { %1148 = vmatprep.subr.bf16.mxu0 %v1147_v25  ;;  %1276 = vmatprep.subr.bf16.mxu1 %v1275_v26 }
 0x166   :  { %v874_v42 = vsub.s32 %v871_v18, %v1494_v41 }
 0x168   :  { %1150 = vmatpush1.bf16.msra.mxu0 %v1149_v33  ;;  %1278 = vmatpush1.bf16.msra.mxu1 %v1277_v34 }
 0x169   :  { %1152 = vmatprep.subr.bf16.mxu0 %v1151_v37  ;;  %1280 = vmatprep.subr.bf16.mxu1 %v1279_v38 }
 0x16c   :  { %1154 = vmatpush1.bf16.msra.mxu0 %v1153_v50  ;;  %1282 = vmatpush1.bf16.msra.mxu1 %v1281_v51 }
 0x16d   :  { %1156 = vmatprep.subr.bf16.mxu0 %v1155_v55  ;;  %1284 = vmatprep.subr.bf16.mxu1 %v1283_v56 }
 0x170   :  { %1158 = vmatpush1.bf16.msra.mxu0 %v1157_v63  ;;  %1286 = vmatpush1.bf16.msra.mxu1 %v1285_v0 }
 0x171   :  { %1160 = vmatprep.subr.bf16.mxu0 %v1159_v3  ;;  %1288 = vmatprep.subr.bf16.mxu1 %v1287_v4 }
 0x174   :  { %1162 = vmatpush1.bf16.msra.mxu0 %v1161_v9  ;;  %1290 = vmatpush1.bf16.msra.mxu1 %v1289_v10 }
 0x177   :  { %709 = vmatmul.mubr.f32.vlgmr.msra.gmra.mrb[2].mxu0 %v293_v12  ;;  %851 = vmatmul.mubr.f32.vlgmr.msra.gmra.mrb[2].mxu1 %v293_v12 }
 0x24a   :  { %v710_v19 = vpop.f32.mrb[2].mxu0  ;;  %v852_v20 = vpop.f32.mrb[2].mxu1 }
 0x24b   :  { %v1291_v21 = vadd.f32 %v710_v19, %v556_v15  ;;  %v1293_v22 = vadd.f32 %v852_v20, %v564_v16  ;;  %v712_v24 = vpop.f32.mrb[3].mxu0  ;;  %v854_v25 = vpop.f32.mrb[3].mxu1 }
 0x24c   :  { %v1292_v26 = vadd.f32 %v712_v24, %v560_v23  ;;  %v1294_v27 = vadd.f32 %v854_v25, %v568_v17 }
 0x24d   :  { %v857_v28 = vmax.f32 %v1291_v21, 0.0  ;;  %v859_v29 = vmax.f32 %v1293_v22, 0.0 }
 0x24e   :  { %v858_v30 = vmax.f32 %v1292_v26, 0.0  ;;  %v860_v31 = vmax.f32 %v1294_v27, 0.0 }
 0x250   :  { %v865_v32 = vcombine.low %v857_v28, %v858_v30  ;;  %v866_v44 = vcombine.high %v857_v28, %v858_v30  ;;  %v867_v33 = vcombine.low %v859_v29, %v860_v31  ;;  %v868_v34 = vcombine.high %v859_v29, %v860_v31 }
 0x252   :  { %v875_v6 = vrot.slane %v865_v32, %v874_v42  ;;  %v882_v35 = vrot.slane %v866_v44, %v874_v42  ;;  %v889_v36 = vrot.slane %v867_v33, %v874_v42  ;;  %v896_v37 = vrot.slane %v868_v34, %v874_v42 }
 0x254   :  { %v897_v38 = vcombine.low %v875_v6, %v889_v36  ;;  %v898_v39 = vcombine.high %v875_v6, %v889_v36  ;;  %v899_v45 = vcombine.low %v882_v35, %v896_v37  ;;  %v900_v46 = vcombine.high %v882_v35, %v896_v37 }
 0x256   :  { %v907_v41 = vrot.slane %v897_v38, %v874_v42  ;;  %v914_v48 = vrot.slane %v899_v45, %v874_v42  ;;  %v921_v49 = vrot.slane %v898_v39, %v874_v42  ;;  %v928_v50 = vrot.slane %v900_v46, %v874_v42 }
 0x258   :  { %v929_v51 = vcombine.high %v907_v41, %v907_v41  ;;  %v930_v52 = vcombine.high %v914_v48, %v914_v48  ;;  %v931_v53 = vcombine.high %v921_v49, %v921_v49  ;;  %v932_v54 = vcombine.high %v928_v50, %v928_v50  ;;  %945 = vst.msk [vmem:[#allocation8] sm:$0xf] %vm1529_vm0, %v907_v41 }
 0x259   :  { %946 = vst.msk [vmem:[#allocation8 + $0x4] sm:$0xf] %vm1529_vm0, %v921_v49  ;;  %949 = vst.msk [vmem:[#allocation8 + $0x10] sm:$0xf] %vm1529_vm0, %v914_v48 }
 0x25a   :  { %950 = vst.msk [vmem:[#allocation8 + $0x14] sm:$0xf] %vm1529_vm0, %v928_v50  ;;  %947 = vst.msk [vmem:[#allocation8 + $0x8] sm:$0xf] %vm1529_vm0, %v929_v51 }
 0x25b   :  { %948 = vst.msk [vmem:[#allocation8 + $0xc] sm:$0xf] %vm1529_vm0, %v931_v53  ;;  %951 = vst.msk [vmem:[#allocation8 + $0x18] sm:$0xf] %vm1529_vm0, %v930_v52 }
 0x25c   :  { %952 = vst.msk [vmem:[#allocation8 + $0x1c] sm:$0xf] %vm1529_vm0, %v932_v54 }
 0x25d   :  { %957 = vsyncadd [#allocation4], 448  ;;  %s1414_s4 = smov [#allocation8]  }
 0x25e   :  { %s958_s9 = sshll.u32 %s1414_s4, 4  ;;  %s959_s9 = int_to_ptr.vmem [resolvable:$true] %s958_s9 }
 0x25f   :  { %s1377_s10 = scalar_lea.vmem %s959_s9, 64  ;;  %s1381_s11 = scalar_lea.vmem %s959_s9, 512 }
 0x260   :  { %p1378_p10 = scmp.ne.s32.totalorder %s959_s9, %s1377_s10  ;;  %p1382_p11 = scmp.lt.s32.totalorder %s959_s9, %s959_s9 }
 0x261   :  { %p1383_p12 = scmp.lt.s32.totalorder %s1381_s11, %s1377_s10 }
 0x263   :  { %p1384_p13 = por %p1383_p12, %p1382_p11 }
 0x265   :  { %p1385_p0 = pnand %p1384_p13, %p1378_p10 }
 0x267   :  { %1388 = shalt.err (!%p1385_p0)
}
 0x268   :  { %s1389_s14 = scalar_lea.hbm %s1566_s5, 64 }
 0x269   :  { %p1390_p1 = scmp.ne.s32.totalorder %s1566_s5, %s1389_s14  ;;  %p1393_p2 = scmp.lt.u32.totalorder %s1389_s14, %s1566_s5 }
 0x26b   :  { %p1395_p3 = pnand %p1393_p2, %p1390_p1 }
 0x26d   :  { %1398 = shalt.err (!%p1395_p3)
}
 0x26e   :  { %s1415_s18 = smov 64   ;;  %s1416_s19 = smov 4  }
 0x26f   :  { %964 = dma.vmem_to_hbm [thread:$0]  %s959_s9, 64, %s1566_s5, [#allocation4], %s1415_s18, %s1415_s18, %s1416_s19  }
 0x270   :  { %1403 = dma.done.wait [#allocation4], 512  }
 0x271   :  { %1404 = vsyncadd [#allocation4], 4294966784 }
 0x272   :  { %968 = vsyncpa [#allocation3], 1 }
 0x273   :  { %969 = vsyncpa [#allocation6], 1 }
 0x274   :  { %970 = vsyncpa [#allocation4], 1 }

</bundles_post_ra>
